<compile_context>
chip_gen: v5e
topology: v5e:2x2
jax: 0.10.0
libtpu: 0.0.40
codegen_flags: <defaults>
</compile_context>

<pallas_src>
import functools

import jax
import jax.numpy as jnp
import numpy as np
from jax.experimental import pallas as pl
from jax.experimental.pallas import tpu as pltpu

EPS = 1e-10
NODE_ALIGN = 256     # node-dim padding / tile unit: v6e & v7x MXUs are 256 wide
BATCH_ALIGN = 16     # bf16 min sublane tile is (16, 128)


def _round_up(x, m):
    return (x + m - 1) // m * m


# --------------------------------------------------------------------------
# Pallas kernel: one NeuralLP propagation step as a K-tiled matmul.
#   out[b, n] = sum_k xw[b, k] * A2[k, n]     with k = r * Np + m,
#               xw[b, r*Np+m] = w[b, r] * x[b, m],  A2 = adjacency.reshape(R2*Np, Np)
# followed (when one node tile covers the graph) by the column normalization
#   out[b, :] /= clamp(sum_n out[b, n], eps)
# --------------------------------------------------------------------------
def _prop_kernel(xw_ref, a_ref, o_ref, *, normalize):
    k = pl.program_id(1)                      # reduction axis, innermost ("arbitrary")

    @pl.when(k == 0)
    def _():
        o_ref[...] = jnp.zeros_like(o_ref)

    a = a_ref[...]
    if a.dtype != jnp.bfloat16:               # int8 HBM encoding -> bf16 on the VPU
        a = a.astype(jnp.bfloat16)
    # (B, TK) bf16 @ (TK, TN) bf16 -> (B, TN) f32 on the MXU, accumulated in place.
    o_ref[...] += jnp.dot(xw_ref[...], a, preferred_element_type=jnp.float32)

    if normalize:
        @pl.when(k == pl.num_programs(1) - 1)
        def _():
            total = jnp.maximum(jnp.sum(o_ref[...], axis=-1, keepdims=True), EPS)
            o_ref[...] = o_ref[...] * (1.0 / total)      # exact divide on a (B, 1) vector


# --------------------------------------------------------------------------
# Generation-aware tiling.
# --------------------------------------------------------------------------
@functools.lru_cache(maxsize=None)
def _tpu_vmem_bytes():
    try:
        info = pltpu.get_tpu_info()
        for name in ("vmem_capacity_bytes", "vmem_bytes", "vmem_size_bytes"):
            v = getattr(info, name, None)
            if v:
                return int(v)
    except Exception:
        pass
    return 64 << 20                            # conservative: v7x per-TensorCore VMEM


def _vmem_policy():
    """Returns (per-step tile budget, vmem_limit cap, force >=2 output node tiles)."""
    phys = _tpu_vmem_bytes()
    if phys >= (100 << 20):                    # v5e / v6e: 128 MiB VMEM, single TC
        return 56 << 20, 96 << 20, False
    # v7x (64 MiB per TC, 2 TCs) or unknown: smaller tiles, and split the "parallel"
    # node-tile axis so it can shard across both TensorCores.
    return 22 << 20, 48 << 20, True


def _divisor_tile(n, max_tile, unit=NODE_ALIGN):
    """Largest multiple of `unit` dividing `n` that is <= max_tile (floor: unit)."""
    q = n // unit
    for d in range(q, 0, -1):
        if q % d == 0 and unit * d <= max_tile:
            return unit * d
    return unit


def _choose_tiles(n_pad, b_pad, a_bytes, budget, force_split):
    # Double-buffered VMEM/step: xw 2*b*tk*2 + adjacency 2*tk*tn*a_bytes + out 2*b*tn*4.
    max_tn = (budget - 4 * b_pad * NODE_ALIGN) // (2 * NODE_ALIGN * a_bytes + 8 * b_pad)
    if force_split and n_pad >= 2 * NODE_ALIGN:
        max_tn = min(max_tn, n_pad // 2)       # megacore: >= 2 output node tiles
    tn = _divisor_tile(n_pad, max(NODE_ALIGN, max_tn))
    max_tk = (budget - 8 * b_pad * tn) // (2 * tn * a_bytes + 4 * b_pad)
    tk = _divisor_tile(n_pad, max(NODE_ALIGN, max_tk))
    return tn, tk


def _vmem_limit(b_pad, tn, tk, a_bytes, cap):
    used = 4 * b_pad * tk + 2 * tk * tn * a_bytes + 8 * b_pad * tn
    return int(min(max(2 * used, 32 << 20), cap))


# --------------------------------------------------------------------------
# Wrapper around the propagation kernel.
# --------------------------------------------------------------------------
def propagate_pallas(adjacency, x, weight):
    """adjacency: (R2, N, N) int8 counts (or float), x: (B, N), weight: (B, R2)
       -> normalized (B, N) f32."""
    R2, N, _ = adjacency.shape
    B = x.shape[0]
    n_pad = _round_up(N, NODE_ALIGN)
    b_pad = _round_up(max(B, BATCH_ALIGN), BATCH_ALIGN)

    # Adjacency: keep the caller's narrow int8 encoding (halves the dominant HBM
    # stream); otherwise stream bf16 (edge multiplicities are small ints -> exact).
    a = adjacency
    if a.dtype not in (jnp.int8, jnp.bfloat16):
        a = a.astype(jnp.bfloat16)
    if n_pad != N:
        a = jnp.pad(a, ((0, 0), (0, n_pad - N), (0, n_pad - N)))
    a2 = a.reshape(R2 * n_pad, n_pad)          # free reshape of the row-major layout
    a_bytes = 1 if a2.dtype == jnp.int8 else 2

    # Fold the relation weights into the contraction: xw[b, r*Np + m] = w[b,r]*x[b,m].
    xw = weight.astype(jnp.float32)[:, :, None] * x.astype(jnp.float32)[:, None, :]
    xw = xw.astype(jnp.bfloat16)               # (B, R2, N)
    if b_pad != B or n_pad != N:
        xw = jnp.pad(xw, ((0, b_pad - B), (0, 0), (0, n_pad - N)))
    xw = xw.reshape(b_pad, R2 * n_pad)

    budget, cap, force_split = _vmem_policy()
    tn, tk = _choose_tiles(n_pad, b_pad, a_bytes, budget, force_split)
    n_tiles = n_pad // tn
    k_tiles = (R2 * n_pad) // tk
    normalize_in_kernel = (n_tiles == 1)       # global node sum needs all tiles otherwise

    out = pl.pallas_call(
        functools.partial(_prop_kernel, normalize=normalize_in_kernel),
        out_shape=jax.ShapeDtypeStruct((b_pad, n_pad), jnp.float32),
        grid_spec=pltpu.PrefetchScalarGridSpec(
            num_scalar_prefetch=0,
            grid=(n_tiles, k_tiles),                                # reduction axis last
            in_specs=[
                pl.BlockSpec((b_pad, tk), lambda j, k: (0, k)),     # xw, streamed over K
                pl.BlockSpec((tk, tn), lambda j, k: (k, j)),        # adjacency stream
            ],
            out_specs=pl.BlockSpec((b_pad, tn), lambda j, k: (0, j)),   # resident over k
        ),
        compiler_params=pltpu.CompilerParams(
            dimension_semantics=("parallel", "arbitrary"),
            vmem_limit_bytes=_vmem_limit(b_pad, tn, tk, a_bytes, cap)),
    )(xw, a2)

    if not normalize_in_kernel:
        out = out / jnp.maximum(jnp.sum(out, axis=-1, keepdims=True), EPS)
    return out[:B, :N]


def propagate_ref(adjacency, x, weight):
    """Pure-JAX reference (also the dispatch path for toy-sized graphs)."""
    out = jnp.einsum('bm,rmn,br->bn',
                     x.astype(jnp.float32),
                     adjacency.astype(jnp.float32),
                     weight.astype(jnp.float32),
                     precision=jax.lax.Precision.HIGHEST)
    total = jnp.maximum(out.sum(-1, keepdims=True), EPS)
    return out / total


def propagate(adjacency, x, weight, *, force_pallas=None):
    """Dispatch: use Pallas when a grid step has enough work to amortize its overhead."""
    R2, N, _ = adjacency.shape
    if force_pallas is None:
        use_pallas = (N >= 256) and (R2 * N * N >= (1 << 20))
    else:
        use_pallas = force_pallas
    if use_pallas:
        return propagate_pallas(adjacency, x, weight)
    return propagate_ref(adjacency, x, weight)


# --------------------------------------------------------------------------
# Deterministic parameter init (shapes follow the PyTorch __init__).
# --------------------------------------------------------------------------
def init_params(key, num_relation, hidden_dim):
    R2 = num_relation * 2
    ks = jax.random.split(key, 9)
    scale = 0.1
    return {
        "query_emb": scale * jax.random.normal(ks[0], (R2 + 1, hidden_dim), jnp.float32),
        "w_ih": scale * jax.random.normal(ks[1], (4 * hidden_dim, hidden_dim), jnp.float32),
        "w_hh": scale * jax.random.normal(ks[2], (4 * hidden_dim, hidden_dim), jnp.float32),
        "b_ih": scale * jax.random.normal(ks[3], (4 * hidden_dim,), jnp.float32),
        "b_hh": scale * jax.random.normal(ks[4], (4 * hidden_dim,), jnp.float32),
        "wl_w": scale * jax.random.normal(ks[5], (R2, hidden_dim), jnp.float32),
        "wl_b": scale * jax.random.normal(ks[6], (R2,), jnp.float32),
        "lin_w": scale * jax.random.normal(ks[7], (1, 1), jnp.float32),
        "lin_b": scale * jax.random.normal(ks[8], (1,), jnp.float32),
    }


def lstm_forward(p, x):
    """Single-layer LSTM, PyTorch semantics. x: (T, B, D) -> (T, B, D)."""
    T = x.shape[0]
    h = jnp.zeros(x.shape[1:], jnp.float32)
    c = jnp.zeros(x.shape[1:], jnp.float32)
    outs = []
    for t in range(T):
        gates = x[t] @ p["w_ih"].T + p["b_ih"] + h @ p["w_hh"].T + p["b_hh"]
        i, f, g, o = jnp.split(gates, 4, axis=-1)
        i = jax.nn.sigmoid(i)
        f = jax.nn.sigmoid(f)
        g = jnp.tanh(g)
        o = jax.nn.sigmoid(o)
        c = f * c + i * g
        h = o * jnp.tanh(c)
        outs.append(h)
    return jnp.stack(outs, axis=0)


# --------------------------------------------------------------------------
# NeuralLP forward (pure JAX glue around the Pallas propagation kernel).
# --------------------------------------------------------------------------
def get_t_output(params, adjacency, num_node_pad, num_relation2, h_index, r_index,
                 num_step, force_pallas=None):
    # TODO(synk): the LSTM / attention / softmax glue is tiny compute and stays in XLA.
    end_index = jnp.full_like(r_index, num_relation2)
    q_index = jnp.stack([r_index] * (num_step - 1) + [end_index], axis=0)   # (T, B)
    query = params["query_emb"][q_index]                                    # (T, B, D)
    hidden = lstm_forward(params, query)                                    # (T, B, D)

    memory = jax.nn.one_hot(h_index, num_node_pad, dtype=jnp.float32)[None]  # (1, B, Np)
    output = None
    for i in range(num_step):
        key = hidden[i]                                                     # (B, D)
        value = hidden[: i + 1]                                             # (t, B, D)
        x = jnp.einsum("bd,tbd->bt", key, value)                            # (B, t)
        attention = jax.nn.softmax(x, axis=-1)
        inp = jnp.einsum("bt,tbn->bn", attention, memory)                   # (B, Np)
        weight = jax.nn.softmax(key @ params["wl_w"].T + params["wl_b"], axis=-1)  # (B, R2)
        output = propagate(adjacency, inp, weight, force_pallas=force_pallas)      # (B, Np)
        memory = jnp.concatenate([memory, output[None]], axis=0)
    return output


def neural_lp_forward(params, edge_list, num_node, num_relation, num_step,
                      h_index, t_index, r_index, force_pallas=None):
    R2 = num_relation * 2
    n_pad = _round_up(num_node, NODE_ALIGN)    # lane-align the node dim once, at build time

    # graph.undirected(add_inverse=True): add (t, h, r + num_relation) for every edge.
    # TODO(synk): the sparse-COO / scatter_add message-passing branch of the original has
    # no clean Pallas equivalent; the graph is materialized as a dense padded adjacency.
    src, dst, rel = edge_list[:, 0], edge_list[:, 1], edge_list[:, 2]
    src_u = jnp.concatenate([src, dst])
    dst_u = jnp.concatenate([dst, src])
    rel_u = jnp.concatenate([rel, rel + num_relation])
    adjacency = jnp.zeros((R2, n_pad, n_pad), jnp.float32)
    adjacency = adjacency.at[rel_u, src_u, dst_u].add(1.0)
    # Edge multiplicities are small integer counts -> int8 HBM encoding halves the
    # dominant stream (clamped to the exact range).
    # TODO(synk): general non-integer / >127 graph.edge_weight would need the bf16 path.
    adjacency = jnp.clip(adjacency, 0.0, 127.0).astype(jnp.int8)

    # negative_sample_to_tail
    is_t_neg = jnp.all(h_index == h_index[:, :1], axis=-1, keepdims=True)
    new_h = jnp.where(is_t_neg, h_index, t_index)
    new_t = jnp.where(is_t_neg, t_index, h_index)
    new_r = jnp.where(is_t_neg, r_index, r_index + num_relation)

    hr_index = new_h * R2 + new_r
    # TODO(synk): true data-dependent dedup (torch.unique) has no Pallas equivalent; use
    # static-size jnp.unique so shapes stay static -- duplicates/fill just become extra
    # (nearly free) query rows on the memory-bound propagation.
    hr_set, hr_inverse = jnp.unique(hr_index, return_inverse=True,
                                    size=hr_index.size, fill_value=0)
    hr_inverse = hr_inverse.reshape(hr_index.shape)
    h_set = hr_set // R2
    r_set = hr_set % R2

    output = get_t_output(params, adjacency, n_pad, R2, h_set, r_set, num_step,
                          force_pallas=force_pallas)                        # (B_unique, Np)

    score = output[hr_inverse, new_t]                                       # (batch, num_sample)
    score = score[..., None] * params["lin_w"][0, 0] + params["lin_b"][0]   # nn.Linear(1, 1)
    return score[..., 0]


if __name__ == "__main__":
    num_relation = 3      # original relations; becomes 6 after add_inverse
    hidden_dim = 32
    num_step = 3
    num_node = 16
    num_edge = 24
    batch, num_sample = 2, 4

    root = jax.random.PRNGKey(0)
    k_param, k_src, k_dst, k_rel = jax.random.split(root, 4)

    params = init_params(k_param, num_relation, hidden_dim)

    src = jax.random.randint(k_src, (num_edge,), 0, num_node)
    dst = jax.random.randint(k_dst, (num_edge,), 0, num_node)
    rel = jax.random.randint(k_rel, (num_edge,), 0, num_relation)
    edge_list = jnp.stack([src, dst, rel], axis=1).astype(jnp.int32)        # (E, 3)

    # row 0: tail negatives (h constant), row 1: head negatives (t constant)
    h_index = jnp.array([[3, 3, 3, 3], [5, 7, 2, 9]], jnp.int32)
    t_index = jnp.array([[1, 4, 6, 2], [8, 8, 8, 8]], jnp.int32)
    r_index = jnp.array([[0, 0, 0, 0], [2, 2, 2, 2]], jnp.int32)

    # --- direct correctness check of the Pallas propagation kernel vs JAX reference ---
    R2 = num_relation * 2
    a_chk = jnp.zeros((R2, num_node, num_node), jnp.float32).at[
        jnp.concatenate([rel, rel + num_relation]),
        jnp.concatenate([src, dst]),
        jnp.concatenate([dst, src])].add(1.0)
    x_chk = jax.nn.softmax(jax.random.normal(jax.random.PRNGKey(1), (5, num_node)), axis=-1)
    w_chk = jax.nn.softmax(jax.random.normal(jax.random.PRNGKey(2), (5, R2)), axis=-1)
    # reference sees the same bf16-rounded operands the kernel consumes
    xw_bf = (w_chk[:, :, None] * x_chk[:, None, :]).astype(jnp.bfloat16).astype(jnp.float32)
    a_bf = a_chk.astype(jnp.bfloat16).astype(jnp.float32)
    want = jnp.einsum('brm,rmn->bn', xw_bf, a_bf, precision=jax.lax.Precision.HIGHEST)
    want = want / jnp.maximum(want.sum(-1, keepdims=True), EPS)

    got_bf16 = jax.block_until_ready(propagate(a_chk, x_chk, w_chk, force_pallas=True))
    np.testing.assert_allclose(np.asarray(got_bf16), np.asarray(want), rtol=1e-2, atol=1e-6)
    got_int8 = jax.block_until_ready(
        propagate(a_chk.astype(jnp.int8), x_chk, w_chk, force_pallas=True))
    np.testing.assert_allclose(np.asarray(got_int8), np.asarray(want), rtol=1e-2, atol=1e-6)

    # --- full forward: heuristic dispatch (toy graph -> XLA einsum) vs forced Pallas ---
    score = neural_lp_forward(params, edge_list, num_node, num_relation, num_step,
                              h_index, t_index, r_index)
    score_pl = neural_lp_forward(params, edge_list, num_node, num_relation, num_step,
                                 h_index, t_index, r_index, force_pallas=True)
    score = jax.block_until_ready(score)
    score_pl = jax.block_until_ready(score_pl)
    assert score.shape == (batch, num_sample)
    assert np.all(np.isfinite(np.asarray(score)))
    np.testing.assert_allclose(np.asarray(score), np.asarray(score_pl), rtol=5e-2, atol=5e-3)
    print("KERNEL_OK")
</pallas_src>

<mosaic_0001>
module attributes {stable_mosaic.version = 11 : i64} {
  func.func @_prop_kernel(%arg0: i32, %arg1: i32, %arg2: memref<16x256xbf16, #tpu.memory_space<vmem>>, %arg3: memref<256x256xbf16, #tpu.memory_space<vmem>>, %arg4: memref<16x256xf32, #tpu.memory_space<vmem>>) attributes {dimension_semantics = [#tpu.dimension_semantics<parallel>, #tpu.dimension_semantics<arbitrary>], iteration_bounds = array<i64: 1, 6>, scalar_prefetch = 0 : i64, scratch_operands = 0 : i64, tpu.core_type = #tpu.core_type<tc>, window_params = [{transform_indices = @transform_0, window_bounds = array<i64: 16, 256>}, {transform_indices = @transform_1, window_bounds = array<i64: 256, 256>}, {transform_indices = @transform_2, window_bounds = array<i64: 16, 256>}]} {
    %c0_i32 = arith.constant 0 : i32
    %0 = arith.cmpi eq, %arg1, %c0_i32 : i32
    %1 = arith.extui %0 : i1 to i32
    %c0_i32_0 = arith.constant 0 : i32
    %2 = arith.cmpi ne, %1, %c0_i32_0 : i32
    scf.if %2 {
      %cst_9 = arith.constant 0.000000e+00 : f32
      %12 = vector.broadcast %cst_9 : f32 to vector<16x256xf32>
      %c0_10 = arith.constant 0 : index
      %c0_11 = arith.constant 0 : index
      %13 = vector.load %arg4[%c0_10, %c0_11] : memref<16x256xf32, #tpu.memory_space<vmem>>, vector<16x256xf32>
      tpu.vector_store %arg4[%c0_10, %c0_11], %12 {strides = array<i32>} : memref<16x256xf32, #tpu.memory_space<vmem>>, vector<16x256xf32>,
    } else {
    }
    %c0 = arith.constant 0 : index
    %c0_1 = arith.constant 0 : index
    %3 = vector.load %arg3[%c0, %c0_1] : memref<256x256xbf16, #tpu.memory_space<vmem>>, vector<256x256xbf16>
    %c0_2 = arith.constant 0 : index
    %c0_3 = arith.constant 0 : index
    %4 = vector.load %arg4[%c0_2, %c0_3] : memref<16x256xf32, #tpu.memory_space<vmem>>, vector<16x256xf32>
    %c0_4 = arith.constant 0 : index
    %c0_5 = arith.constant 0 : index
    %5 = vector.load %arg2[%c0_4, %c0_5] : memref<16x256xbf16, #tpu.memory_space<vmem>>, vector<16x256xbf16>
    %cst = arith.constant dense<0.000000e+00> : vector<16x256xf32>
    %6 = tpu.matmul %5, %3, %cst {dimension_numbers = #tpu.dot_dimension_numbers<[1], [0], [0], [1], [0, 0, 1, 1], [], []>} : vector<16x256xbf16>, vector<256x256xbf16>, vector<16x256xf32> -> vector<16x256xf32>
    %7 = arith.addf %4, %6 : vector<16x256xf32>
    %c0_6 = arith.constant 0 : index
    %c0_7 = arith.constant 0 : index
    %8 = vector.load %arg4[%c0_6, %c0_7] : memref<16x256xf32, #tpu.memory_space<vmem>>, vector<16x256xf32>
    tpu.vector_store %arg4[%c0_6, %c0_7], %7 {strides = array<i32>} : memref<16x256xf32, #tpu.memory_space<vmem>>, vector<16x256xf32>,
    %c5_i32 = arith.constant 5 : i32
    %9 = arith.cmpi eq, %arg1, %c5_i32 : i32
    %10 = arith.extui %9 : i1 to i32
    %c0_i32_8 = arith.constant 0 : i32
    %11 = arith.cmpi ne, %10, %c0_i32_8 : i32
    scf.if %11 {
      %c0_9 = arith.constant 0 : index
      %c0_10 = arith.constant 0 : index
      %12 = vector.load %arg4[%c0_9, %c0_10] : memref<16x256xf32, #tpu.memory_space<vmem>>, vector<16x256xf32>
      %cst_11 = arith.constant dense<0.000000e+00> : vector<16xf32>
      %13 = vector.multi_reduction <add>, %12, %cst_11 [1] : vector<16x256xf32> to vector<16xf32>
      %14 = vector.shape_cast %13 : vector<16xf32> to vector<16x1xf32>
      %cst_12 = arith.constant 1.000000e-10 : f32
      %15 = vector.broadcast %cst_12 : f32 to vector<16x1xf32>
      %16 = arith.maximumf %14, %15 : vector<16x1xf32>
      %c0_13 = arith.constant 0 : index
      %c0_14 = arith.constant 0 : index
      %17 = vector.load %arg4[%c0_13, %c0_14] : memref<16x256xf32, #tpu.memory_space<vmem>>, vector<16x256xf32>
      %cst_15 = arith.constant 1.000000e+00 : f32
      %18 = vector.broadcast %cst_15 : f32 to vector<16x1xf32>
      %19 = arith.divf %18, %16 : vector<16x1xf32>
      %20 = vector.broadcast %19 : vector<16x1xf32> to vector<16x256xf32>
      %21 = arith.mulf %17, %20 : vector<16x256xf32>
      %c0_16 = arith.constant 0 : index
      %c0_17 = arith.constant 0 : index
      %22 = vector.load %arg4[%c0_16, %c0_17] : memref<16x256xf32, #tpu.memory_space<vmem>>, vector<16x256xf32>
      tpu.vector_store %arg4[%c0_16, %c0_17], %21 {strides = array<i32>} : memref<16x256xf32, #tpu.memory_space<vmem>>, vector<16x256xf32>,
    } else {
    }
    return
  }
  func.func @transform_0(%arg0: i32, %arg1: i32) -> (i32, i32) {
    %c0_i32 = arith.constant 0 : i32
    %c0_i32_0 = arith.constant 0 : i32
    return %c0_i32, %arg1 : i32, i32
  }
  func.func @transform_1(%arg0: i32, %arg1: i32) -> (i32, i32) {
    %c0_i32 = arith.constant 0 : i32
    return %arg1, %arg0 : i32, i32
  }
  func.func @transform_2(%arg0: i32, %arg1: i32) -> (i32, i32) {
    %c0_i32 = arith.constant 0 : i32
    %c0_i32_0 = arith.constant 0 : i32
    return %c0_i32, %arg0 : i32, i32
  }
}

</mosaic_0001>

<bundles_post_ra>
// kernel: tpu_custom_call.1
= control target key start
LH: loop header
LB: loop body
LE: loop exit
PB: predicated region body
PF: predicated region fallthrough
CT: control target
= control target key end

     0   :  { %7 = vsyncpa [#allocation3], 0  ;;  %s1280_s0 = inlined_call_operand.hbm [shape: bf16[16,1536], index: 0, kind: input, shape index: {}]   ;;  %s1281_s1 = inlined_call_operand.hbm [shape: bf16[1536,256], index: 1, kind: input, shape index: {}]   ;;  %s1282_s2 = inlined_call_operand.hbm [shape: f32[16,256], index: 2, kind: output, shape index: {}]  }
   0x1   :  { %9 = vsyncpa [#allocation3 + $0x1], 0 }
   0x2   :  { %10 = vsyncpa [#allocation6], 0 }
   0x3   :  { %12 = vsyncpa [#allocation6 + $0x1], 0 }
   0x4   :  { %13 = vsyncpa [#allocation4], 0  ;;  %s1094_s9 = smov 0   ;;  %s1096_s10 = smov 0  }
   0x5   :  { %s1098_s11 = smov 0   ;;  %s1100_s12 = smov 0  }
   0x6   :  { %s1102_s13 = smov 0   ;;  %s1104_s14 = smov 0  }
   0x7 LB: > { %s655_s15 = sadd.s32 4294967295, %s1070_s14   ;;  %s28_s16 = sadd.s32 1, %s1066_s13  ;;  %s1070_s14 = sphi %s1104_s14, %s19_s14   ;;  %s1066_s13 = sphi %s1102_s13, %s1290_s13   ;;  %s1062_s12 = sphi %s1100_s12, %s1289_s12   ;;  %s1058_s11 = sphi %s1098_s11, %s1288_s11   ;;  %s1054_s10 = sphi %s1096_s10, %s1287_s10   ;;  %s1050_s9 = sphi %s1094_s9, %s1286_s9  }
   0x8   : > { %p29_p0 = scmp.ge.s32.totalorder %s28_s16, 6  ;;  %s38_s17 = sadd.s32 1, %s1058_s11 }
   0x9   : > { %p45_p1 = scmp.ne.s32.totalorder %s1058_s11, %s1054_s10  ;;  %p46_p2 = scmp.eq.s32.totalorder %s1070_s14, 0 }
   0xa   : > { %s1292_s16 = smov (%p29_p0, %s28_s16), 0  ;;  %p51_p4 = scmp.ne.s32.totalorder %s1054_s10, %s1050_s9 }
   0xb   : > { %p1130_p3 = por %p46_p2, %p45_p1  ;;  %s35_s19 = ssub.s32 %s1066_s13, %s1292_s16 }
   0xc   : > { %p52_p5 = scmp.eq.s32.totalorder %s655_s15, 0  ;;  %p36_p6 = scmp.eq.s32.totalorder %s35_s19, 0 }
   0xd   : > { %p862_p8 = scmp.lt.s32.totalorder %s1070_s14, 6  ;;  %s1148_s22 = sand.u32 1, %s1058_s11  }
   0xe   : > { %p1139_p7 = por %p52_p5, %p51_p4  ;;  %s810_s23 = sshll.u32 %s1066_s13, 3 }
   0xf   : > { %s1145_s21 = scalar_select %p36_p6, %s1058_s11, %s38_s17  }
  0x10   : > { %s658_s24 = sshll.u32 %s1148_s22, 4  ;;  %s138_s27 = scalar_lea.hbm %s1280_s0, %s810_s23 }
  0x11   : > { %s139_s28 = sshll.u32 %s138_s27, 4  ;;  %s133_s29 = scalar_lea.vmem [#allocation2], %s658_s24  ;;  %s140_s28 = int_to_ptr.hbm [resolvable:$true] %s139_s28 }
  0x12   : > { %s141_s30 = sshll.u32 %s133_s29, 4  ;;  %p1157_p9 = pnand %p862_p8, %p1130_p3  ;;  %s142_s30 = int_to_ptr.vmem [resolvable:$true] %s141_s30 }
  0x13   : > { %p665_p10 = scmp.ge.s32.totalorder %s1070_s14, 1  ;;  %s130_s4 = scalar_lea.sflag [#allocation3], %s1148_s22 }
  0x14   : > { %s1072_s5 = smov 768   ;;  %s1073_s6 = smov 128  }
  0x15   : > { %s1074_s7 = smov 8   ;;  %p174_p11 = scmp.lt.s32.totalorder %s1070_s14, 7 }
  0x16   : > { %858 = dma.hbm_to_vmem [thread:$0]  (!%p1157_p9), %s140_s28, 256, %s142_s30, %s130_s4, %s1072_s5, %s1073_s6, %s1074_s7  }
  0x17   : > { %s661_s8 = sshll.u32 %s1148_s22, 8  ;;  %s812_s9 = sshll.u32 %s1066_s13, 8 }
  0x18   : > { %p175_p12 = pnand %p665_p10, %p174_p11  ;;  %s163_s19 = scalar_lea.hbm %s1281_s1, %s812_s9 }
  0x19   : > { %s155_s23 = scalar_lea.vmem [#allocation5], %s661_s8  ;;  %s164_s25 = sshll.u32 %s163_s19, 4  ;;  %s165_s25 = int_to_ptr.hbm [resolvable:$true] %s164_s25 }
  0x1a   : > { %s166_s24 = sshll.u32 %s155_s23, 4  ;;  %s152_s26 = scalar_lea.sflag [#allocation6], %s1148_s22  ;;  %s167_s24 = int_to_ptr.vmem [resolvable:$true] %s166_s24 }
  0x1b   : > { %861 = dma.hbm_to_vmem [thread:$0]  (!%p1157_p9), %s165_s25, 4096, %s167_s24, %s152_s26, %s1073_s6, %s1073_s6, %s1074_s7  }
  0x1c   : > { %178 = sbr.rel (%p175_p12) target bundleno = 386 (0x182), region = 28  ;;  %s180_s27 = sand.u32 (!%p175_p12), 1, %s1054_s10  }
  0x1d   : > { %s666_s28 = sshll.u32 (!%p175_p12), %s180_s27, 4  ;;  %s181_s29 = scalar_lea.sflag (!%p175_p12), [#allocation3], %s180_s27 }
  0x1e   : > { %s1175_s30 = scalar_lea.vmem (!%p175_p12), [#allocation2], %s666_s28 }
  0x21   : > { %1037 = dma.done.wait (%p1139_p7), %s181_s29, 256  }
  0x22   : > { %1039 = vsyncadd (%p1139_p7), %s181_s29, 4294967040  ;;  %s667_s4 = sshll.u32 %s180_s27, 8  ;;  %s191_s5 = scalar_lea.sflag [#allocation6], %s180_s27 }
  0x23   : > { %s1181_s8 = scalar_lea.vmem [#allocation5], %s667_s4 }
  0x24   : > { %1041 = dma.done.wait (%p1139_p7), %s191_s5, 4096  }
  0x25   : > { %1043 = vsyncadd (%p1139_p7), %s191_s5, 4294963200  ;;  %p668_p13 = scmp.ne.s32.totalorder %s1062_s12, 0 }
  0x27   : > { %223 = sbr.rel (%p668_p13) target bundleno = 49 (0x31), region = 40 }
  0x2c   : > { %v1075_v0 = vmov 0.0  }
  0x2d   : > { %224 = vst [vmem:[#allocation7] sm:$0xff] %v1075_v0 }
  0x2e   : > { %225 = vst [vmem:[#allocation7 + $0x8] sm:$0xff] %v1075_v0 }
  0x2f   : > { %226 = vst [vmem:[#allocation7 + $0x10] sm:$0xff] %v1075_v0 }
  0x30   : > { %227 = vst [vmem:[#allocation7 + $0x18] sm:$0xff] %v1075_v0 }
  0x31 PF: > { %v735_v1 = vld [vmem:[%s1181_s8 + $0x70] sm:$0xf]  ;;  %v828_v2 = vld [vmem:[%s1181_s8 + $0x74] sm:$0xf0]  ;;  %v827_v6 = vld [vmem:[%s1181_s8 + $0x74] sm:$0xf] }
  0x32   : > { %v799_v3 = vld [vmem:[%s1181_s8 + $0xf0] sm:$0xf]  ;;  %v736_v4 = vor.u32 %v828_v2, %v735_v1  ;;  %v844_v5 = vld [vmem:[%s1181_s8 + $0xf4] sm:$0xf0]  ;;  %v737_v7 = vld [vmem:[%s1181_s8 + $0x78] sm:$0xf0] }
  0x33   : > { %v800_v8 = vor.u32 %v844_v5, %v799_v3  ;;  %v740_v9 = vor.u32 %v827_v6, %v737_v7  ;;  %v843_v10 = vld [vmem:[%s1181_s8 + $0xf4] sm:$0xf]  ;;  %v801_v11 = vld [vmem:[%s1181_s8 + $0xf8] sm:$0xf0]  ;;  %v727_v12 = vld [vmem:[%s1181_s8 + $0x60] sm:$0xf] }
  0x34   : > { %436 = vmatpush.bf16.msra.mxu0 %v736_v4  ;;  %v804_v13 = vor.u32 %v843_v10, %v801_v11  ;;  %v826_v14 = vld [vmem:[%s1181_s8 + $0x64] sm:$0xf0]  ;;  %v791_v15 = vld [vmem:[%s1181_s8 + $0xe0] sm:$0xf]  ;;  %v825_v19 = vld [vmem:[%s1181_s8 + $0x64] sm:$0xf] }
  0x35   : > { %v842_v16 = vld [vmem:[%s1181_s8 + $0xe4] sm:$0xf0]  ;;  %450 = vmatpush.bf16.msra.mxu1 %v800_v8  ;;  %464 = vmatpush.bf16.msra.mxu2 %v740_v9  ;;  %v728_v17 = vor.u32 %v826_v14, %v727_v12  ;;  %v729_v20 = vld [vmem:[%s1181_s8 + $0x68] sm:$0xf0]  ;;  %v841_v21 = vld [vmem:[%s1181_s8 + $0xe4] sm:$0xf] }
  0x36   : > { %v792_v18 = vor.u32 %v842_v16, %v791_v15  ;;  %478 = vmatpush.bf16.msra.mxu3 %v804_v13  ;;  %v732_v22 = vor.u32 %v825_v19, %v729_v20  ;;  %v793_v23 = vld [vmem:[%s1181_s8 + $0xe8] sm:$0xf0]  ;;  %v719_v24 = vld [vmem:[%s1181_s8 + $0x50] sm:$0xf]  ;;  %v824_v25 = vld [vmem:[%s1181_s8 + $0x54] sm:$0xf0] }
  0x37   : > { %v796_v26 = vor.u32 %v841_v21, %v793_v23  ;;  %v783_v27 = vld [vmem:[%s1181_s8 + $0xd0] sm:$0xf]  ;;  %v840_v28 = vld [vmem:[%s1181_s8 + $0xd4] sm:$0xf0]  ;;  %v823_v29 = vld [vmem:[%s1181_s8 + $0x54] sm:$0xf]  ;;  %v720_v30 = vor.u32 %v824_v25, %v719_v24 }
  0x38   : > { %437 = vmatpush.bf16.msra.mxu0 %v728_v17  ;;  %v721_v31 = vld [vmem:[%s1181_s8 + $0x58] sm:$0xf0]  ;;  %v839_v32 = vld [vmem:[%s1181_s8 + $0xd4] sm:$0xf]  ;;  %v784_v34 = vor.u32 %v840_v28, %v783_v27  ;;  %v711_v36 = vld [vmem:[%s1181_s8 + $0x40] sm:$0xf] }
  0x39   : > { %v785_v33 = vld [vmem:[%s1181_s8 + $0xd8] sm:$0xf0]  ;;  %451 = vmatpush.bf16.msra.mxu1 %v792_v18  ;;  %465 = vmatpush.bf16.msra.mxu2 %v732_v22  ;;  %v724_v35 = vor.u32 %v823_v29, %v721_v31  ;;  %v822_v37 = vld [vmem:[%s1181_s8 + $0x44] sm:$0xf0]  ;;  %v775_v38 = vld [vmem:[%s1181_s8 + $0xc0] sm:$0xf] }
  0x3a   : > { %479 = vmatpush.bf16.msra.mxu3 %v796_v26  ;;  %v788_v39 = vor.u32 %v839_v32, %v785_v33  ;;  %v838_v40 = vld [vmem:[%s1181_s8 + $0xc4] sm:$0xf0]  ;;  %v821_v41 = vld [vmem:[%s1181_s8 + $0x44] sm:$0xf]  ;;  %v713_v42 = vld [vmem:[%s1181_s8 + $0x48] sm:$0xf0]  ;;  %v712_v45 = vor.u32 %v822_v37, %v711_v36 }
  0x3b   : > { %v837_v43 = vld [vmem:[%s1181_s8 + $0xc4] sm:$0xf]  ;;  %v777_v44 = vld [vmem:[%s1181_s8 + $0xc8] sm:$0xf0]  ;;  %v776_v46 = vor.u32 %v838_v40, %v775_v38  ;;  %v716_v47 = vor.u32 %v821_v41, %v713_v42  ;;  %v703_v48 = vld [vmem:[%s1181_s8 + $0x30] sm:$0xf] }
  0x3c   : > { %438 = vmatpush.bf16.msra.mxu0 %v720_v30  ;;  %v820_v49 = vld [vmem:[%s1181_s8 + $0x34] sm:$0xf0]  ;;  %v767_v50 = vld [vmem:[%s1181_s8 + $0xb0] sm:$0xf]  ;;  %v780_v51 = vor.u32 %v837_v43, %v777_v44  ;;  %v819_v53 = vld [vmem:[%s1181_s8 + $0x34] sm:$0xf] }
  0x3d   : > { %452 = vmatpush.bf16.msra.mxu1 %v784_v34  ;;  %466 = vmatpush.bf16.msra.mxu2 %v724_v35  ;;  %v836_v52 = vld [vmem:[%s1181_s8 + $0xb4] sm:$0xf0]  ;;  %v705_v54 = vld [vmem:[%s1181_s8 + $0x38] sm:$0xf0]  ;;  %v835_v55 = vld [vmem:[%s1181_s8 + $0xb4] sm:$0xf]  ;;  %v704_v57 = vor.u32 %v820_v49, %v703_v48 }
  0x3e   : > { %480 = vmatpush.bf16.msra.mxu3 %v788_v39  ;;  %v769_v56 = vld [vmem:[%s1181_s8 + $0xb8] sm:$0xf0]  ;;  %v768_v58 = vor.u32 %v836_v52, %v767_v50  ;;  %v708_v59 = vor.u32 %v819_v53, %v705_v54  ;;  %v695_v60 = vld [vmem:[%s1181_s8 + $0x20] sm:$0xf]  ;;  %v818_v61 = vld [vmem:[%s1181_s8 + $0x24] sm:$0xf0] }
  0x3f   : > { %v759_v62 = vld [vmem:[%s1181_s8 + $0xa0] sm:$0xf]  ;;  %v772_v63 = vor.u32 %v835_v55, %v769_v56  ;;  %v834_v0 = vld [vmem:[%s1181_s8 + $0xa4] sm:$0xf0]  ;;  %v817_v1 = vld [vmem:[%s1181_s8 + $0x24] sm:$0xf]  ;;  %v696_v5 = vor.u32 %v818_v61, %v695_v60 }
  0x40   : > { %439 = vmatpush.bf16.msra.mxu0 %v712_v45  ;;  %v697_v2 = vld [vmem:[%s1181_s8 + $0x28] sm:$0xf0]  ;;  %v833_v3 = vld [vmem:[%s1181_s8 + $0xa4] sm:$0xf]  ;;  %v760_v6 = vor.u32 %v834_v0, %v759_v62  ;;  %v687_v8 = vld [vmem:[%s1181_s8 + $0x10] sm:$0xf] }
  0x41   : > { %453 = vmatpush.bf16.msra.mxu1 %v776_v46  ;;  %467 = vmatpush.bf16.msra.mxu2 %v716_v47  ;;  %v761_v4 = vld [vmem:[%s1181_s8 + $0xa8] sm:$0xf0]  ;;  %v700_v7 = vor.u32 %v817_v1, %v697_v2  ;;  %v816_v9 = vld [vmem:[%s1181_s8 + $0x14] sm:$0xf0]  ;;  %v751_v10 = vld [vmem:[%s1181_s8 + $0x90] sm:$0xf] }
  0x42   : > { %481 = vmatpush.bf16.msra.mxu3 %v780_v51  ;;  %v764_v11 = vor.u32 %v833_v3, %v761_v4  ;;  %v832_v12 = vld [vmem:[%s1181_s8 + $0x94] sm:$0xf0]  ;;  %v815_v13 = vld [vmem:[%s1181_s8 + $0x14] sm:$0xf]  ;;  %v689_v14 = vld [vmem:[%s1181_s8 + $0x18] sm:$0xf0]  ;;  %v688_v17 = vor.u32 %v816_v9, %v687_v8 }
  0x43   : > { %v831_v15 = vld [vmem:[%s1181_s8 + $0x94] sm:$0xf]  ;;  %v753_v16 = vld [vmem:[%s1181_s8 + $0x98] sm:$0xf0]  ;;  %v752_v18 = vor.u32 %v832_v12, %v751_v10  ;;  %v692_v19 = vor.u32 %v815_v13, %v689_v14  ;;  %v679_v20 = vld [vmem:[%s1181_s8] sm:$0xf] }
  0x44   : > { %440 = vmatpush.bf16.msra.mxu0 %v704_v57  ;;  %v814_v21 = vld [vmem:[%s1181_s8 + $0x4] sm:$0xf0]  ;;  %v743_v22 = vld [vmem:[%s1181_s8 + $0x80] sm:$0xf]  ;;  %v756_v23 = vor.u32 %v831_v15, %v753_v16  ;;  %v813_v25 = vld [vmem:[%s1181_s8 + $0x4] sm:$0xf] }
  0x45   : > { %454 = vmatpush.bf16.msra.mxu1 %v768_v58  ;;  %468 = vmatpush.bf16.msra.mxu2 %v708_v59  ;;  %v830_v24 = vld [vmem:[%s1181_s8 + $0x84] sm:$0xf0]  ;;  %v681_v26 = vld [vmem:[%s1181_s8 + $0x8] sm:$0xf0]  ;;  %v829_v27 = vld [vmem:[%s1181_s8 + $0x84] sm:$0xf]  ;;  %v680_v29 = vor.u32 %v814_v21, %v679_v20 }
  0x46   : > { %482 = vmatpush.bf16.msra.mxu3 %v772_v63  ;;  %v745_v28 = vld [vmem:[%s1181_s8 + $0x88] sm:$0xf0]  ;;  %v671_v30 = vld [vmem:[%s1175_s30] sm:$0xf]  ;;  %v846_v31 = vld [vmem:[%s1175_s30 + $0x4] sm:$0xf0]  ;;  %v744_v32 = vor.u32 %v830_v24, %v743_v22  ;;  %v684_v33 = vor.u32 %v813_v25, %v681_v26 }
  0x47   : > { %v845_v34 = vld [vmem:[%s1175_s30 + $0x4] sm:$0xf]  ;;  %v673_v35 = vld [vmem:[%s1175_s30 + $0x8] sm:$0xf0]  ;;  %v748_v36 = vor.u32 %v829_v27, %v745_v28  ;;  %v672_v37 = vor.u32 %v846_v31, %v671_v30  ;;  %p805_p0 = scmp.ne.s32.totalorder %s1062_s12, 5 }
  0x48   : > { %441 = vmatpush.bf16.msra.mxu0 %v696_v5  ;;  %v676_v38 = vor.u32 %v845_v34, %v673_v35  ;;  %v260_v40 = vld [vmem:[#allocation7] sm:$0xff]  ;;  %v261_v45 = vld [vmem:[#allocation7 + $0x8] sm:$0xff]  ;;  %v262_v49 = vld [vmem:[#allocation7 + $0x10] sm:$0xff] }
  0x49   : > { %455 = vmatpush.bf16.msra.mxu1 %v760_v6  ;;  %469 = vmatpush.bf16.msra.mxu2 %v700_v7  ;;  %v263_v55 = vld [vmem:[#allocation7 + $0x18] sm:$0xff] }
  0x4a   : > { %483 = vmatpush.bf16.msra.mxu3 %v764_v11 }
  0x4c   : > { %442 = vmatpush.bf16.msra.mxu0 %v688_v17 }
  0x4d   : > { %456 = vmatpush.bf16.msra.mxu1 %v752_v18  ;;  %470 = vmatpush.bf16.msra.mxu2 %v692_v19 }
  0x4e   : > { %484 = vmatpush.bf16.msra.mxu3 %v756_v23 }
  0x50   : > { %443 = vmatpush.bf16.msra.mxu0 %v680_v29 }
  0x51   : > { %457 = vmatpush.bf16.msra.mxu1 %v744_v32  ;;  %471 = vmatpush.bf16.msra.mxu2 %v684_v33 }
  0x52   : > { %485 = vmatpush.bf16.msra.mxu3 %v748_v36 }
  0x53   : > { %444 = vmatmul.bf16.vlgmr.msra.gmra.mxu0 %v672_v37 }
  0x54   : > { %458 = vmatmul.bf16.vlgmr.msra.gmra.mxu1 %v676_v38  ;;  %472 = vmatmul.bf16.vlgmr.msra.gmra.mxu2 %v672_v37 }
  0x55   : > { %486 = vmatmul.bf16.vlgmr.msra.gmra.mxu3 %v676_v38 }
  0xd0   : > { %v445_v39 = vpop.f32.mrf.mxu0 }
  0xd1   : > { %v459_v41 = vpop.f32.mrf.mxu1 }
  0xd2   : > { %v460_v42 = vadd.f32 %v459_v41, %v445_v39 }
  0xd4   : > { %v492_v43 = vadd.f32 %v460_v42, %v260_v40 }
  0xd6   : > { %496 = vst [vmem:[#allocation7] sm:$0xff] %v492_v43 }
  0xd7   : > { %v473_v44 = vpop.f32.mrf.mxu2 }
  0xd8   : > { %v487_v46 = vpop.f32.mrf.mxu3  ;;  %v447_v47 = vpop.f32.mrf.mxu0 }
  0xd9   : > { %v488_v48 = vadd.f32 %v487_v46, %v473_v44  ;;  %v461_v50 = vpop.f32.mrf.mxu1 }
  0xda   : > { %v462_v51 = vadd.f32 %v461_v50, %v447_v47 }
  0xdb   : > { %v493_v52 = vadd.f32 %v488_v48, %v261_v45 }
  0xdc   : > { %v494_v53 = vadd.f32 %v462_v51, %v262_v49 }
  0xdd   : > { %497 = vst [vmem:[#allocation7 + $0x8] sm:$0xff] %v493_v52 }
  0xde   : > { %498 = vst [vmem:[#allocation7 + $0x10] sm:$0xff] %v494_v53 }
  0xdf   : > { %v475_v54 = vpop.f32.mrf.mxu2 }
  0xe0   : > { %v489_v56 = vpop.f32.mrf.mxu3 }
  0xe1   : > { %v490_v57 = vadd.f32 %v489_v56, %v475_v54  ;;  %503 = sbr.rel (%p805_p0) target bundleno = 380 (0x17c), region = 44 }
  0xe3   : > { %v495_v58 = vadd.f32 %v490_v57, %v263_v55 }
  0xe5   : > { %499 = vst [vmem:[#allocation7 + $0x18] sm:$0xff] %v495_v58 }
  0xe6   : > { %v504_v59 = vld [vmem:[#allocation7] sm:$0xff]  ;;  %v505_v60 = vld [vmem:[#allocation7 + $0x8] sm:$0xff]  ;;  %v506_v62 = vld [vmem:[#allocation7 + $0x10] sm:$0xff] }
  0xe7   : > { %v508_v61 = vadd.f32 %v505_v60, %v504_v59 }
  0xe9   : > { %509 = vadd.xlane.f32.xlu0 %v508_v61 }
  0xec   : > { %v507_v63 = vld [vmem:[#allocation7 + $0x18] sm:$0xff] }
  0xed   : > { %v511_v0 = vadd.f32 %v507_v63, %v506_v62 }
  0xf1   : > { %512 = vadd.xlane.f32.xlu0 %v511_v0 }
 0x15c   : > { %v510_v1 = vpop.xlane.xlu0 %509 }
 0x15d   : > { %v514_v2 = vmax.f32 %v510_v1, 1e-10 }
 0x15f   : > { %920 = vrcp.f32 %v514_v2  ;;  %v527_v8 = vand.u32 2147483648, %v514_v2  ;;  %v525_v10 = vand.u32 2147483647, %v514_v2  ;;  %vm521_vm1 = vweird.f32 %v514_v2 }
 0x161   : > { %v528_v13 = vor.u32 1.1754944e-38, %v527_v8  ;;  %vm526_vm3 = vcmp.eq.f32.partialorder %v525_v10, 8.507059e+37 }
 0x164   : > { %v513_v3 = vpop.xlane.xlu0 %512 }
 0x165   : > { %v921_v4 = vpop.eup %920  ;;  %v515_v5 = vmax.f32 %v513_v3, 1e-10 }
 0x166   : > { %v517_v6 = vmul.f32 %v921_v4, %v514_v2  ;;  %vm522_vm0 = vweird.f32 %v921_v4 }
 0x167   : > { %922 = vrcp.f32 %v515_v5  ;;  %vm523_vm2 = vmor %vm521_vm1, %vm522_vm0  ;;  %v542_v20 = vand.u32 2147483648, %v515_v5  ;;  %v540_v22 = vand.u32 2147483647, %v515_v5  ;;  %vm536_vm5 = vweird.f32 %v515_v5 }
 0x168   : > { %v518_v7 = vsub.f32 1.0, %v517_v6 }
 0x169   : > { %v543_v24 = vor.u32 1.1754944e-38, %v542_v20  ;;  %vm541_vm7 = vcmp.eq.f32.partialorder %v540_v22, 8.507059e+37 }
 0x16a   : > { %v519_v9 = vmul.f32 %v921_v4, %v518_v7 }
 0x16c   : > { %v520_v11 = vadd.f32 %v921_v4, %v519_v9 }
 0x16d   : > { %v923_v12 = vpop.eup %922 }
 0x16e   : > { %v524_v14 = vsel %vm523_vm2, %v921_v4, %v520_v11  ;;  %v532_v15 = vmul.f32 %v923_v12, %v515_v5  ;;  %vm537_vm4 = vweird.f32 %v923_v12 }
 0x16f   : > { %v529_v16 = vsel %vm526_vm3, %v528_v13, %v524_v14  ;;  %vm538_vm6 = vmor %vm536_vm5, %vm537_vm4 }
 0x170   : > { %v546_v17 = vmul.f32 %v529_v16, %v504_v59  ;;  %v547_v18 = vmul.f32 %v529_v16, %v505_v60  ;;  %v533_v19 = vsub.f32 1.0, %v532_v15 }
 0x172   : > { %550 = vst [vmem:[#allocation7] sm:$0xff] %v546_v17  ;;  %v534_v21 = vmul.f32 %v923_v12, %v533_v19 }
 0x173   : > { %551 = vst [vmem:[#allocation7 + $0x8] sm:$0xff] %v547_v18 }
 0x174   : > { %v535_v23 = vadd.f32 %v923_v12, %v534_v21 }
 0x176   : > { %v539_v25 = vsel %vm538_vm6, %v923_v12, %v535_v23 }
 0x177   : > { %v544_v26 = vsel %vm541_vm7, %v543_v24, %v539_v25 }
 0x178   : > { %v548_v27 = vmul.f32 %v544_v26, %v506_v62  ;;  %v549_v28 = vmul.f32 %v544_v26, %v507_v63 }
 0x17a   : > { %552 = vst [vmem:[#allocation7 + $0x10] sm:$0xff] %v548_v27 }
 0x17b   : > { %553 = vst [vmem:[#allocation7 + $0x18] sm:$0xff] %v549_v28 }
 0x17c PF: > { %p863_p1 = scmp.eq.s32.totalorder %s655_s15, 5  ;;  %s564_s22 = sshll.u32 %s1282_s2, 4  ;;  %s565_s22 = int_to_ptr.hbm [resolvable:$true] %s564_s22 }
 0x17d   : > { %s1076_s3 = smov [#allocation7]   ;;  %s1077_s7 = smov 256  }
 0x17e   : > { %s562_s6 = sshll.u32 %s1076_s3, 4  ;;  %s1078_s9 = smov 16   ;;  %s563_s6 = int_to_ptr.vmem [resolvable:$true] %s562_s6 }
 0x17f   : > { %852 = dma.vmem_to_hbm [thread:$0]  (%p863_p1), %s563_s6, 512, %s565_s22, [#allocation4], %s1077_s7, %s1077_s7, %s1078_s9  }
 0x180   : > { %1045 = dma.done.wait (%p863_p1), [#allocation4], 512  }
 0x181   : > { %1047 = vsyncadd (%p863_p1), [#allocation4], 4294966784 }
 0x182 PF: > { %s19_s14 = sadd.s32 1, %s1070_s14   ;;  %s1286_s9 = smov %s1054_s10 }
 0x183   : > { %p16_p2 = scmp.ge.s32.totalorder %s19_s14, 8   ;;  %s1287_s10 = smov %s1058_s11 }
 0x184   : > { %s1288_s11 = smov %s1145_s21  ;;  %s1289_s12 = smov %s1066_s13 }
 0x185   : > { %s1290_s13 = smov %s1292_s16  ;;  %18 = sbr.rel (!%p16_p2) target bundleno = 7 (0x7), region = 87 }
 0x18a   :  { %581 = vsyncpa [#allocation3], 1 }
 0x18b   :  { %583 = vsyncpa [#allocation3 + $0x1], 1 }
 0x18c   :  { %584 = vsyncpa [#allocation6], 1 }
 0x18d   :  { %586 = vsyncpa [#allocation6 + $0x1], 1 }
 0x18e   :  { %587 = vsyncpa [#allocation4], 1 }
 0x18f   :  { %589 = vsyncpa [#allocation4 + $0x1], 1 }

</bundles_post_ra>
